<compile_context>
chip_gen: v5e
topology: v5e:2x2
jax: 0.10.0
libtpu: 0.0.40
codegen_flags: <defaults>
</compile_context>

<pallas_src>
import jax
import jax.numpy as jnp
from jax.experimental import pallas as pl
from jax.experimental.pallas import tpu as pltpu


LAYER_DIMS = ((8, 6), (6, 4), (4, 2), (2, 1))  # (in_features, out_features)
_LANE = 1024      # lane width of a packed batch slab (multiple of 128)
_SUBLANE = 64     # sublanes per grid step (multiple of 8) -> 65 536 batch/step


def _mlp_kernel(x_ref,
                w1_ref, b1_ref,
                w2_ref, b2_ref,
                w3_ref, b3_ref,
                w4_ref, b4_ref,
                o_ref):
    # x_ref: (8, S, L) f32 VMEM  -- batch packed across sublanes (S) and lanes (L).
    # w_i:   (out, in) f32 SMEM  -- PyTorch layout, sigmoid-folded (see prepare_params).
    # b_i:   (out,)    f32 SMEM.
    # o_ref: (S, L)    f32 VMEM  -- sublane+lane dense output slab.
    n_feat = LAYER_DIMS[0][0]
    rows = [x_ref[k] for k in range(n_feat)]          # each (S, L)

    w_refs = (w1_ref, w2_ref, w3_ref, w4_ref)
    b_refs = (b1_ref, b2_ref, b3_ref, b4_ref)
    for (n_in, n_out), w_ref, b_ref in zip(LAYER_DIMS, w_refs, b_refs):
        new_rows = []
        for j in range(n_out):
            acc = rows[0] * w_ref[j, 0]
            for k in range(1, n_in):
                acc = acc + rows[k] * w_ref[j, k]
            # Folded params: every layer is a plain tanh (single EUP op).
            new_rows.append(jnp.tanh(acc + b_ref[j]))
        rows = new_rows

    # Map the last tanh back to sigmoid: sigmoid(z) = 0.5*tanh(0.5*z) + 0.5.
    o_ref[...] = rows[0] * 0.5 + 0.5


def prepare_params(params):
    """One-time parameter prep (hoisted out of the forward pass).

    Folds the sigmoid affine into the weights so the kernel only evaluates
    tanh(W'' h + b'') per layer:
      * the 0.5 inside tanh(0.5*z) is absorbed into (W, b);
      * the 0.5*t + 0.5 output of the previous layer is absorbed into the
        next layer's (W, b):  W a + b = 0.5*W t + (b + 0.5*sum_k W[:,k]).
    Only the final output applies 0.5*t + 0.5 (done in the kernel).
    Weights stay in PyTorch (out_features, in_features) layout.
    """
    folded = []
    prev_is_tanh = False
    for w, b in params:
        w = jnp.asarray(w, jnp.float32)
        b = jnp.asarray(b, jnp.float32)
        if prev_is_tanh:
            b = b + 0.5 * jnp.sum(w, axis=1)
            w = 0.5 * w
        # absorb the 0.5 inside tanh(0.5 * z)
        w = 0.5 * w
        b = 0.5 * b
        folded.append(w)
        folded.append(b)
        prev_is_tanh = True
    return tuple(folded)


def _round_up(n, m):
    return (n + m - 1) // m * m


def _forward_feature_major_impl(x_t, *flat_params):
    """x_t: (8, B) float32, feature-major (batch on the trailing axis)."""
    n_feat, batch = x_t.shape

    lane = _LANE if batch >= _LANE else _round_up(batch, 128)
    b_pad = _round_up(batch, lane)
    if b_pad != batch:
        x_t = jnp.pad(x_t, ((0, 0), (0, b_pad - batch)))
    rows = b_pad // lane
    sub = _SUBLANE if rows >= _SUBLANE else rows      # sub==rows -> full-dim block
    grid = (pl.cdiv(rows, sub),)

    # Free (metadata-only) reshape: batch packed as (rows, lane).
    x3 = x_t.reshape(n_feat, rows, lane)

    smem_spec = pl.BlockSpec(memory_space=pltpu.SMEM)

    out = pl.pallas_call(
        _mlp_kernel,
        out_shape=jax.ShapeDtypeStruct((rows, lane), jnp.float32),
        grid=grid,
        in_specs=[
            pl.BlockSpec((n_feat, sub, lane), lambda i: (0, i, 0)),  # x slab
            smem_spec, smem_spec,   # w1, b1
            smem_spec, smem_spec,   # w2, b2
            smem_spec, smem_spec,   # w3, b3
            smem_spec, smem_spec,   # w4, b4
        ],
        out_specs=pl.BlockSpec((sub, lane), lambda i: (i, 0)),
        compiler_params=pltpu.CompilerParams(
            dimension_semantics=("parallel",),
            vmem_limit_bytes=32 * 1024 * 1024),
    )(x3, *flat_params)

    out_flat = out.reshape(b_pad)
    if b_pad != batch:
        out_flat = out_flat[:batch]
    return out_flat.reshape(batch, 1)


def _forward_impl(x, *flat_params):
    # PyTorch interface: x is (B, 8) batch-major -> one layout pass to (8, B).
    # For peak throughput on huge batches, call mlp_forward_feature_major with
    # feature-major data and skip this transpose.
    return _forward_feature_major_impl(x.T, *flat_params)


mlp_forward = jax.jit(_forward_impl)
mlp_forward_feature_major = jax.jit(_forward_feature_major_impl)


def init_params(key):
    """Deterministic init matching nn.Linear default: U(-1/sqrt(fan_in), +1/sqrt(fan_in))."""
    params = []
    for (fan_in, fan_out) in LAYER_DIMS:
        key, kw, kb = jax.random.split(key, 3)
        bound = 1.0 / jnp.sqrt(fan_in)
        w = jax.random.uniform(kw, (fan_out, fan_in), jnp.float32, -bound, bound)
        b = jax.random.uniform(kb, (fan_out,), jnp.float32, -bound, bound)
        params.append((w, b))
    return params


def reference_forward(x, params):
    h = x
    for w, b in params:
        h = jax.nn.sigmoid(h @ w.T + b)
    return h


if __name__ == "__main__":
    key = jax.random.PRNGKey(0)
    kx, kp = jax.random.split(key)

    params = init_params(kp)
    prepared = prepare_params(params)   # one-time prep (sigmoid folding), reused

    # Small batch: single block, block dims == full array dims (B padded to 128 lanes).
    x_small = jax.random.normal(kx, (8, 8), jnp.float32)
    out_small = jax.block_until_ready(mlp_forward(x_small, *prepared))
    ref_small = reference_forward(x_small, params)
    assert out_small.shape == (8, 1)
    assert jnp.allclose(out_small, ref_small, atol=1e-4, rtol=1e-4)

    # Non-multiple batch: exercises lane padding (2000 -> 2048) + slicing back.
    x_mid = jax.random.normal(kx, (2000, 8), jnp.float32)
    out_mid = jax.block_until_ready(mlp_forward(x_mid, *prepared))
    ref_mid = reference_forward(x_mid, params)
    assert out_mid.shape == (2000, 1)
    assert jnp.allclose(out_mid, ref_mid, atol=1e-4, rtol=1e-4)

    # Larger batch: exercises the packed (8, 64, 1024) slabs, multi-step parallel
    # grid and a partial trailing block (70000 -> 69 packed rows of 1024).
    x_big = jax.random.normal(kx, (70000, 8), jnp.float32)
    out_big = jax.block_until_ready(mlp_forward(x_big, *prepared))
    ref_big = reference_forward(x_big, params)
    assert out_big.shape == (70000, 1)
    assert jnp.allclose(out_big, ref_big, atol=1e-4, rtol=1e-4)

    # Feature-major fast path (no wrapper transpose).
    out_fm = jax.block_until_ready(mlp_forward_feature_major(x_big.T, *prepared))
    assert jnp.allclose(out_fm, ref_big, atol=1e-4, rtol=1e-4)

    print("KERNEL_OK")
</pallas_src>

<mosaic_0001>
module attributes {stable_mosaic.version = 11 : i64} {
  func.func @_mlp_kernel(%arg0: i32, %arg1: memref<8x1x128xf32, #tpu.memory_space<vmem>>, %arg2: memref<6x8xf32, #tpu.memory_space<smem>>, %arg3: memref<6xf32, #tpu.memory_space<smem>>, %arg4: memref<4x6xf32, #tpu.memory_space<smem>>, %arg5: memref<4xf32, #tpu.memory_space<smem>>, %arg6: memref<2x4xf32, #tpu.memory_space<smem>>, %arg7: memref<2xf32, #tpu.memory_space<smem>>, %arg8: memref<1x2xf32, #tpu.memory_space<smem>>, %arg9: memref<1xf32, #tpu.memory_space<smem>>, %arg10: memref<1x128xf32, #tpu.memory_space<vmem>>) attributes {dimension_semantics = [#tpu.dimension_semantics<parallel>], iteration_bounds = array<i64: 1>, scalar_prefetch = 0 : i64, scratch_operands = 0 : i64, tpu.core_type = #tpu.core_type<tc>, window_params = [{transform_indices = @transform_0, window_bounds = array<i64: 8, 1, 128>}, {transform_indices = @transform_1, window_bounds = array<i64: 6, 8>}, {transform_indices = @transform_2, window_bounds = array<i64: 6>}, {transform_indices = @transform_3, window_bounds = array<i64: 4, 6>}, {transform_indices = @transform_4, window_bounds = array<i64: 4>}, {transform_indices = @transform_5, window_bounds = array<i64: 2, 4>}, {transform_indices = @transform_6, window_bounds = array<i64: 2>}, {transform_indices = @transform_7, window_bounds = array<i64: 1, 2>}, {transform_indices = @transform_8, window_bounds = array<i64: 1>}, {transform_indices = @transform_9, window_bounds = array<i64: 1, 128>}]} {
    %c0 = arith.constant 0 : index
    %c0_0 = arith.constant 0 : index
    %c0_1 = arith.constant 0 : index
    %0 = vector.load %arg1[%c0, %c0_0, %c0_1] : memref<8x1x128xf32, #tpu.memory_space<vmem>>, vector<1x1x128xf32>
    %1 = vector.shape_cast %0 : vector<1x1x128xf32> to vector<1x128xf32>
    %c1 = arith.constant 1 : index
    %c0_2 = arith.constant 0 : index
    %c0_3 = arith.constant 0 : index
    %2 = vector.load %arg1[%c1, %c0_2, %c0_3] : memref<8x1x128xf32, #tpu.memory_space<vmem>>, vector<1x1x128xf32>
    %3 = vector.shape_cast %2 : vector<1x1x128xf32> to vector<1x128xf32>
    %c2 = arith.constant 2 : index
    %c0_4 = arith.constant 0 : index
    %c0_5 = arith.constant 0 : index
    %4 = vector.load %arg1[%c2, %c0_4, %c0_5] : memref<8x1x128xf32, #tpu.memory_space<vmem>>, vector<1x1x128xf32>
    %5 = vector.shape_cast %4 : vector<1x1x128xf32> to vector<1x128xf32>
    %c3 = arith.constant 3 : index
    %c0_6 = arith.constant 0 : index
    %c0_7 = arith.constant 0 : index
    %6 = vector.load %arg1[%c3, %c0_6, %c0_7] : memref<8x1x128xf32, #tpu.memory_space<vmem>>, vector<1x1x128xf32>
    %7 = vector.shape_cast %6 : vector<1x1x128xf32> to vector<1x128xf32>
    %c4 = arith.constant 4 : index
    %c0_8 = arith.constant 0 : index
    %c0_9 = arith.constant 0 : index
    %8 = vector.load %arg1[%c4, %c0_8, %c0_9] : memref<8x1x128xf32, #tpu.memory_space<vmem>>, vector<1x1x128xf32>
    %9 = vector.shape_cast %8 : vector<1x1x128xf32> to vector<1x128xf32>
    %c5 = arith.constant 5 : index
    %c0_10 = arith.constant 0 : index
    %c0_11 = arith.constant 0 : index
    %10 = vector.load %arg1[%c5, %c0_10, %c0_11] : memref<8x1x128xf32, #tpu.memory_space<vmem>>, vector<1x1x128xf32>
    %11 = vector.shape_cast %10 : vector<1x1x128xf32> to vector<1x128xf32>
    %c6 = arith.constant 6 : index
    %c0_12 = arith.constant 0 : index
    %c0_13 = arith.constant 0 : index
    %12 = vector.load %arg1[%c6, %c0_12, %c0_13] : memref<8x1x128xf32, #tpu.memory_space<vmem>>, vector<1x1x128xf32>
    %13 = vector.shape_cast %12 : vector<1x1x128xf32> to vector<1x128xf32>
    %c7 = arith.constant 7 : index
    %c0_14 = arith.constant 0 : index
    %c0_15 = arith.constant 0 : index
    %14 = vector.load %arg1[%c7, %c0_14, %c0_15] : memref<8x1x128xf32, #tpu.memory_space<vmem>>, vector<1x1x128xf32>
    %15 = vector.shape_cast %14 : vector<1x1x128xf32> to vector<1x128xf32>
    %c0_16 = arith.constant 0 : index
    %c0_17 = arith.constant 0 : index
    %16 = memref.load %arg2[%c0_16, %c0_17] : memref<6x8xf32, #tpu.memory_space<smem>>
    %17 = vector.broadcast %16 : f32 to vector<1x128xf32>
    %18 = arith.mulf %1, %17 : vector<1x128xf32>
    %c0_18 = arith.constant 0 : index
    %c1_19 = arith.constant 1 : index
    %19 = memref.load %arg2[%c0_18, %c1_19] : memref<6x8xf32, #tpu.memory_space<smem>>
    %20 = vector.broadcast %19 : f32 to vector<1x128xf32>
    %21 = arith.mulf %3, %20 : vector<1x128xf32>
    %22 = arith.addf %18, %21 : vector<1x128xf32>
    %c0_20 = arith.constant 0 : index
    %c2_21 = arith.constant 2 : index
    %23 = memref.load %arg2[%c0_20, %c2_21] : memref<6x8xf32, #tpu.memory_space<smem>>
    %24 = vector.broadcast %23 : f32 to vector<1x128xf32>
    %25 = arith.mulf %5, %24 : vector<1x128xf32>
    %26 = arith.addf %22, %25 : vector<1x128xf32>
    %c0_22 = arith.constant 0 : index
    %c3_23 = arith.constant 3 : index
    %27 = memref.load %arg2[%c0_22, %c3_23] : memref<6x8xf32, #tpu.memory_space<smem>>
    %28 = vector.broadcast %27 : f32 to vector<1x128xf32>
    %29 = arith.mulf %7, %28 : vector<1x128xf32>
    %30 = arith.addf %26, %29 : vector<1x128xf32>
    %c0_24 = arith.constant 0 : index
    %c4_25 = arith.constant 4 : index
    %31 = memref.load %arg2[%c0_24, %c4_25] : memref<6x8xf32, #tpu.memory_space<smem>>
    %32 = vector.broadcast %31 : f32 to vector<1x128xf32>
    %33 = arith.mulf %9, %32 : vector<1x128xf32>
    %34 = arith.addf %30, %33 : vector<1x128xf32>
    %c0_26 = arith.constant 0 : index
    %c5_27 = arith.constant 5 : index
    %35 = memref.load %arg2[%c0_26, %c5_27] : memref<6x8xf32, #tpu.memory_space<smem>>
    %36 = vector.broadcast %35 : f32 to vector<1x128xf32>
    %37 = arith.mulf %11, %36 : vector<1x128xf32>
    %38 = arith.addf %34, %37 : vector<1x128xf32>
    %c0_28 = arith.constant 0 : index
    %c6_29 = arith.constant 6 : index
    %39 = memref.load %arg2[%c0_28, %c6_29] : memref<6x8xf32, #tpu.memory_space<smem>>
    %40 = vector.broadcast %39 : f32 to vector<1x128xf32>
    %41 = arith.mulf %13, %40 : vector<1x128xf32>
    %42 = arith.addf %38, %41 : vector<1x128xf32>
    %c0_30 = arith.constant 0 : index
    %c7_31 = arith.constant 7 : index
    %43 = memref.load %arg2[%c0_30, %c7_31] : memref<6x8xf32, #tpu.memory_space<smem>>
    %44 = vector.broadcast %43 : f32 to vector<1x128xf32>
    %45 = arith.mulf %15, %44 : vector<1x128xf32>
    %46 = arith.addf %42, %45 : vector<1x128xf32>
    %c0_32 = arith.constant 0 : index
    %47 = memref.load %arg3[%c0_32] : memref<6xf32, #tpu.memory_space<smem>>
    %48 = vector.broadcast %47 : f32 to vector<1x128xf32>
    %49 = arith.addf %46, %48 : vector<1x128xf32>
    %50 = math.tanh %49 : vector<1x128xf32>
    %c1_33 = arith.constant 1 : index
    %c0_34 = arith.constant 0 : index
    %51 = memref.load %arg2[%c1_33, %c0_34] : memref<6x8xf32, #tpu.memory_space<smem>>
    %52 = vector.broadcast %51 : f32 to vector<1x128xf32>
    %53 = arith.mulf %1, %52 : vector<1x128xf32>
    %c1_35 = arith.constant 1 : index
    %c1_36 = arith.constant 1 : index
    %54 = memref.load %arg2[%c1_35, %c1_36] : memref<6x8xf32, #tpu.memory_space<smem>>
    %55 = vector.broadcast %54 : f32 to vector<1x128xf32>
    %56 = arith.mulf %3, %55 : vector<1x128xf32>
    %57 = arith.addf %53, %56 : vector<1x128xf32>
    %c1_37 = arith.constant 1 : index
    %c2_38 = arith.constant 2 : index
    %58 = memref.load %arg2[%c1_37, %c2_38] : memref<6x8xf32, #tpu.memory_space<smem>>
    %59 = vector.broadcast %58 : f32 to vector<1x128xf32>
    %60 = arith.mulf %5, %59 : vector<1x128xf32>
    %61 = arith.addf %57, %60 : vector<1x128xf32>
    %c1_39 = arith.constant 1 : index
    %c3_40 = arith.constant 3 : index
    %62 = memref.load %arg2[%c1_39, %c3_40] : memref<6x8xf32, #tpu.memory_space<smem>>
    %63 = vector.broadcast %62 : f32 to vector<1x128xf32>
    %64 = arith.mulf %7, %63 : vector<1x128xf32>
    %65 = arith.addf %61, %64 : vector<1x128xf32>
    %c1_41 = arith.constant 1 : index
    %c4_42 = arith.constant 4 : index
    %66 = memref.load %arg2[%c1_41, %c4_42] : memref<6x8xf32, #tpu.memory_space<smem>>
    %67 = vector.broadcast %66 : f32 to vector<1x128xf32>
    %68 = arith.mulf %9, %67 : vector<1x128xf32>
    %69 = arith.addf %65, %68 : vector<1x128xf32>
    %c1_43 = arith.constant 1 : index
    %c5_44 = arith.constant 5 : index
    %70 = memref.load %arg2[%c1_43, %c5_44] : memref<6x8xf32, #tpu.memory_space<smem>>
    %71 = vector.broadcast %70 : f32 to vector<1x128xf32>
    %72 = arith.mulf %11, %71 : vector<1x128xf32>
    %73 = arith.addf %69, %72 : vector<1x128xf32>
    %c1_45 = arith.constant 1 : index
    %c6_46 = arith.constant 6 : index
    %74 = memref.load %arg2[%c1_45, %c6_46] : memref<6x8xf32, #tpu.memory_space<smem>>
    %75 = vector.broadcast %74 : f32 to vector<1x128xf32>
    %76 = arith.mulf %13, %75 : vector<1x128xf32>
    %77 = arith.addf %73, %76 : vector<1x128xf32>
    %c1_47 = arith.constant 1 : index
    %c7_48 = arith.constant 7 : index
    %78 = memref.load %arg2[%c1_47, %c7_48] : memref<6x8xf32, #tpu.memory_space<smem>>
    %79 = vector.broadcast %78 : f32 to vector<1x128xf32>
    %80 = arith.mulf %15, %79 : vector<1x128xf32>
    %81 = arith.addf %77, %80 : vector<1x128xf32>
    %c1_49 = arith.constant 1 : index
    %82 = memref.load %arg3[%c1_49] : memref<6xf32, #tpu.memory_space<smem>>
    %83 = vector.broadcast %82 : f32 to vector<1x128xf32>
    %84 = arith.addf %81, %83 : vector<1x128xf32>
    %85 = math.tanh %84 : vector<1x128xf32>
    %c2_50 = arith.constant 2 : index
    %c0_51 = arith.constant 0 : index
    %86 = memref.load %arg2[%c2_50, %c0_51] : memref<6x8xf32, #tpu.memory_space<smem>>
    %87 = vector.broadcast %86 : f32 to vector<1x128xf32>
    %88 = arith.mulf %1, %87 : vector<1x128xf32>
    %c2_52 = arith.constant 2 : index
    %c1_53 = arith.constant 1 : index
    %89 = memref.load %arg2[%c2_52, %c1_53] : memref<6x8xf32, #tpu.memory_space<smem>>
    %90 = vector.broadcast %89 : f32 to vector<1x128xf32>
    %91 = arith.mulf %3, %90 : vector<1x128xf32>
    %92 = arith.addf %88, %91 : vector<1x128xf32>
    %c2_54 = arith.constant 2 : index
    %c2_55 = arith.constant 2 : index
    %93 = memref.load %arg2[%c2_54, %c2_55] : memref<6x8xf32, #tpu.memory_space<smem>>
    %94 = vector.broadcast %93 : f32 to vector<1x128xf32>
    %95 = arith.mulf %5, %94 : vector<1x128xf32>
    %96 = arith.addf %92, %95 : vector<1x128xf32>
    %c2_56 = arith.constant 2 : index
    %c3_57 = arith.constant 3 : index
    %97 = memref.load %arg2[%c2_56, %c3_57] : memref<6x8xf32, #tpu.memory_space<smem>>
    %98 = vector.broadcast %97 : f32 to vector<1x128xf32>
    %99 = arith.mulf %7, %98 : vector<1x128xf32>
    %100 = arith.addf %96, %99 : vector<1x128xf32>
    %c2_58 = arith.constant 2 : index
    %c4_59 = arith.constant 4 : index
    %101 = memref.load %arg2[%c2_58, %c4_59] : memref<6x8xf32, #tpu.memory_space<smem>>
    %102 = vector.broadcast %101 : f32 to vector<1x128xf32>
    %103 = arith.mulf %9, %102 : vector<1x128xf32>
    %104 = arith.addf %100, %103 : vector<1x128xf32>
    %c2_60 = arith.constant 2 : index
    %c5_61 = arith.constant 5 : index
    %105 = memref.load %arg2[%c2_60, %c5_61] : memref<6x8xf32, #tpu.memory_space<smem>>
    %106 = vector.broadcast %105 : f32 to vector<1x128xf32>
    %107 = arith.mulf %11, %106 : vector<1x128xf32>
    %108 = arith.addf %104, %107 : vector<1x128xf32>
    %c2_62 = arith.constant 2 : index
    %c6_63 = arith.constant 6 : index
    %109 = memref.load %arg2[%c2_62, %c6_63] : memref<6x8xf32, #tpu.memory_space<smem>>
    %110 = vector.broadcast %109 : f32 to vector<1x128xf32>
    %111 = arith.mulf %13, %110 : vector<1x128xf32>
    %112 = arith.addf %108, %111 : vector<1x128xf32>
    %c2_64 = arith.constant 2 : index
    %c7_65 = arith.constant 7 : index
    %113 = memref.load %arg2[%c2_64, %c7_65] : memref<6x8xf32, #tpu.memory_space<smem>>
    %114 = vector.broadcast %113 : f32 to vector<1x128xf32>
    %115 = arith.mulf %15, %114 : vector<1x128xf32>
    %116 = arith.addf %112, %115 : vector<1x128xf32>
    %c2_66 = arith.constant 2 : index
    %117 = memref.load %arg3[%c2_66] : memref<6xf32, #tpu.memory_space<smem>>
    %118 = vector.broadcast %117 : f32 to vector<1x128xf32>
    %119 = arith.addf %116, %118 : vector<1x128xf32>
    %120 = math.tanh %119 : vector<1x128xf32>
    %c3_67 = arith.constant 3 : index
    %c0_68 = arith.constant 0 : index
    %121 = memref.load %arg2[%c3_67, %c0_68] : memref<6x8xf32, #tpu.memory_space<smem>>
    %122 = vector.broadcast %121 : f32 to vector<1x128xf32>
    %123 = arith.mulf %1, %122 : vector<1x128xf32>
    %c3_69 = arith.constant 3 : index
    %c1_70 = arith.constant 1 : index
    %124 = memref.load %arg2[%c3_69, %c1_70] : memref<6x8xf32, #tpu.memory_space<smem>>
    %125 = vector.broadcast %124 : f32 to vector<1x128xf32>
    %126 = arith.mulf %3, %125 : vector<1x128xf32>
    %127 = arith.addf %123, %126 : vector<1x128xf32>
    %c3_71 = arith.constant 3 : index
    %c2_72 = arith.constant 2 : index
    %128 = memref.load %arg2[%c3_71, %c2_72] : memref<6x8xf32, #tpu.memory_space<smem>>
    %129 = vector.broadcast %128 : f32 to vector<1x128xf32>
    %130 = arith.mulf %5, %129 : vector<1x128xf32>
    %131 = arith.addf %127, %130 : vector<1x128xf32>
    %c3_73 = arith.constant 3 : index
    %c3_74 = arith.constant 3 : index
    %132 = memref.load %arg2[%c3_73, %c3_74] : memref<6x8xf32, #tpu.memory_space<smem>>
    %133 = vector.broadcast %132 : f32 to vector<1x128xf32>
    %134 = arith.mulf %7, %133 : vector<1x128xf32>
    %135 = arith.addf %131, %134 : vector<1x128xf32>
    %c3_75 = arith.constant 3 : index
    %c4_76 = arith.constant 4 : index
    %136 = memref.load %arg2[%c3_75, %c4_76] : memref<6x8xf32, #tpu.memory_space<smem>>
    %137 = vector.broadcast %136 : f32 to vector<1x128xf32>
    %138 = arith.mulf %9, %137 : vector<1x128xf32>
    %139 = arith.addf %135, %138 : vector<1x128xf32>
    %c3_77 = arith.constant 3 : index
    %c5_78 = arith.constant 5 : index
    %140 = memref.load %arg2[%c3_77, %c5_78] : memref<6x8xf32, #tpu.memory_space<smem>>
    %141 = vector.broadcast %140 : f32 to vector<1x128xf32>
    %142 = arith.mulf %11, %141 : vector<1x128xf32>
    %143 = arith.addf %139, %142 : vector<1x128xf32>
    %c3_79 = arith.constant 3 : index
    %c6_80 = arith.constant 6 : index
    %144 = memref.load %arg2[%c3_79, %c6_80] : memref<6x8xf32, #tpu.memory_space<smem>>
    %145 = vector.broadcast %144 : f32 to vector<1x128xf32>
    %146 = arith.mulf %13, %145 : vector<1x128xf32>
    %147 = arith.addf %143, %146 : vector<1x128xf32>
    %c3_81 = arith.constant 3 : index
    %c7_82 = arith.constant 7 : index
    %148 = memref.load %arg2[%c3_81, %c7_82] : memref<6x8xf32, #tpu.memory_space<smem>>
    %149 = vector.broadcast %148 : f32 to vector<1x128xf32>
    %150 = arith.mulf %15, %149 : vector<1x128xf32>
    %151 = arith.addf %147, %150 : vector<1x128xf32>
    %c3_83 = arith.constant 3 : index
    %152 = memref.load %arg3[%c3_83] : memref<6xf32, #tpu.memory_space<smem>>
    %153 = vector.broadcast %152 : f32 to vector<1x128xf32>
    %154 = arith.addf %151, %153 : vector<1x128xf32>
    %155 = math.tanh %154 : vector<1x128xf32>
    %c4_84 = arith.constant 4 : index
    %c0_85 = arith.constant 0 : index
    %156 = memref.load %arg2[%c4_84, %c0_85] : memref<6x8xf32, #tpu.memory_space<smem>>
    %157 = vector.broadcast %156 : f32 to vector<1x128xf32>
    %158 = arith.mulf %1, %157 : vector<1x128xf32>
    %c4_86 = arith.constant 4 : index
    %c1_87 = arith.constant 1 : index
    %159 = memref.load %arg2[%c4_86, %c1_87] : memref<6x8xf32, #tpu.memory_space<smem>>
    %160 = vector.broadcast %159 : f32 to vector<1x128xf32>
    %161 = arith.mulf %3, %160 : vector<1x128xf32>
    %162 = arith.addf %158, %161 : vector<1x128xf32>
    %c4_88 = arith.constant 4 : index
    %c2_89 = arith.constant 2 : index
    %163 = memref.load %arg2[%c4_88, %c2_89] : memref<6x8xf32, #tpu.memory_space<smem>>
    %164 = vector.broadcast %163 : f32 to vector<1x128xf32>
    %165 = arith.mulf %5, %164 : vector<1x128xf32>
    %166 = arith.addf %162, %165 : vector<1x128xf32>
    %c4_90 = arith.constant 4 : index
    %c3_91 = arith.constant 3 : index
    %167 = memref.load %arg2[%c4_90, %c3_91] : memref<6x8xf32, #tpu.memory_space<smem>>
    %168 = vector.broadcast %167 : f32 to vector<1x128xf32>
    %169 = arith.mulf %7, %168 : vector<1x128xf32>
    %170 = arith.addf %166, %169 : vector<1x128xf32>
    %c4_92 = arith.constant 4 : index
    %c4_93 = arith.constant 4 : index
    %171 = memref.load %arg2[%c4_92, %c4_93] : memref<6x8xf32, #tpu.memory_space<smem>>
    %172 = vector.broadcast %171 : f32 to vector<1x128xf32>
    %173 = arith.mulf %9, %172 : vector<1x128xf32>
    %174 = arith.addf %170, %173 : vector<1x128xf32>
    %c4_94 = arith.constant 4 : index
    %c5_95 = arith.constant 5 : index
    %175 = memref.load %arg2[%c4_94, %c5_95] : memref<6x8xf32, #tpu.memory_space<smem>>
    %176 = vector.broadcast %175 : f32 to vector<1x128xf32>
    %177 = arith.mulf %11, %176 : vector<1x128xf32>
    %178 = arith.addf %174, %177 : vector<1x128xf32>
    %c4_96 = arith.constant 4 : index
    %c6_97 = arith.constant 6 : index
    %179 = memref.load %arg2[%c4_96, %c6_97] : memref<6x8xf32, #tpu.memory_space<smem>>
    %180 = vector.broadcast %179 : f32 to vector<1x128xf32>
    %181 = arith.mulf %13, %180 : vector<1x128xf32>
    %182 = arith.addf %178, %181 : vector<1x128xf32>
    %c4_98 = arith.constant 4 : index
    %c7_99 = arith.constant 7 : index
    %183 = memref.load %arg2[%c4_98, %c7_99] : memref<6x8xf32, #tpu.memory_space<smem>>
    %184 = vector.broadcast %183 : f32 to vector<1x128xf32>
    %185 = arith.mulf %15, %184 : vector<1x128xf32>
    %186 = arith.addf %182, %185 : vector<1x128xf32>
    %c4_100 = arith.constant 4 : index
    %187 = memref.load %arg3[%c4_100] : memref<6xf32, #tpu.memory_space<smem>>
    %188 = vector.broadcast %187 : f32 to vector<1x128xf32>
    %189 = arith.addf %186, %188 : vector<1x128xf32>
    %190 = math.tanh %189 : vector<1x128xf32>
    %c5_101 = arith.constant 5 : index
    %c0_102 = arith.constant 0 : index
    %191 = memref.load %arg2[%c5_101, %c0_102] : memref<6x8xf32, #tpu.memory_space<smem>>
    %192 = vector.broadcast %191 : f32 to vector<1x128xf32>
    %193 = arith.mulf %1, %192 : vector<1x128xf32>
    %c5_103 = arith.constant 5 : index
    %c1_104 = arith.constant 1 : index
    %194 = memref.load %arg2[%c5_103, %c1_104] : memref<6x8xf32, #tpu.memory_space<smem>>
    %195 = vector.broadcast %194 : f32 to vector<1x128xf32>
    %196 = arith.mulf %3, %195 : vector<1x128xf32>
    %197 = arith.addf %193, %196 : vector<1x128xf32>
    %c5_105 = arith.constant 5 : index
    %c2_106 = arith.constant 2 : index
    %198 = memref.load %arg2[%c5_105, %c2_106] : memref<6x8xf32, #tpu.memory_space<smem>>
    %199 = vector.broadcast %198 : f32 to vector<1x128xf32>
    %200 = arith.mulf %5, %199 : vector<1x128xf32>
    %201 = arith.addf %197, %200 : vector<1x128xf32>
    %c5_107 = arith.constant 5 : index
    %c3_108 = arith.constant 3 : index
    %202 = memref.load %arg2[%c5_107, %c3_108] : memref<6x8xf32, #tpu.memory_space<smem>>
    %203 = vector.broadcast %202 : f32 to vector<1x128xf32>
    %204 = arith.mulf %7, %203 : vector<1x128xf32>
    %205 = arith.addf %201, %204 : vector<1x128xf32>
    %c5_109 = arith.constant 5 : index
    %c4_110 = arith.constant 4 : index
    %206 = memref.load %arg2[%c5_109, %c4_110] : memref<6x8xf32, #tpu.memory_space<smem>>
    %207 = vector.broadcast %206 : f32 to vector<1x128xf32>
    %208 = arith.mulf %9, %207 : vector<1x128xf32>
    %209 = arith.addf %205, %208 : vector<1x128xf32>
    %c5_111 = arith.constant 5 : index
    %c5_112 = arith.constant 5 : index
    %210 = memref.load %arg2[%c5_111, %c5_112] : memref<6x8xf32, #tpu.memory_space<smem>>
    %211 = vector.broadcast %210 : f32 to vector<1x128xf32>
    %212 = arith.mulf %11, %211 : vector<1x128xf32>
    %213 = arith.addf %209, %212 : vector<1x128xf32>
    %c5_113 = arith.constant 5 : index
    %c6_114 = arith.constant 6 : index
    %214 = memref.load %arg2[%c5_113, %c6_114] : memref<6x8xf32, #tpu.memory_space<smem>>
    %215 = vector.broadcast %214 : f32 to vector<1x128xf32>
    %216 = arith.mulf %13, %215 : vector<1x128xf32>
    %217 = arith.addf %213, %216 : vector<1x128xf32>
    %c5_115 = arith.constant 5 : index
    %c7_116 = arith.constant 7 : index
    %218 = memref.load %arg2[%c5_115, %c7_116] : memref<6x8xf32, #tpu.memory_space<smem>>
    %219 = vector.broadcast %218 : f32 to vector<1x128xf32>
    %220 = arith.mulf %15, %219 : vector<1x128xf32>
    %221 = arith.addf %217, %220 : vector<1x128xf32>
    %c5_117 = arith.constant 5 : index
    %222 = memref.load %arg3[%c5_117] : memref<6xf32, #tpu.memory_space<smem>>
    %223 = vector.broadcast %222 : f32 to vector<1x128xf32>
    %224 = arith.addf %221, %223 : vector<1x128xf32>
    %225 = math.tanh %224 : vector<1x128xf32>
    %c0_118 = arith.constant 0 : index
    %c0_119 = arith.constant 0 : index
    %226 = memref.load %arg4[%c0_118, %c0_119] : memref<4x6xf32, #tpu.memory_space<smem>>
    %227 = vector.broadcast %226 : f32 to vector<1x128xf32>
    %228 = arith.mulf %50, %227 : vector<1x128xf32>
    %c0_120 = arith.constant 0 : index
    %c1_121 = arith.constant 1 : index
    %229 = memref.load %arg4[%c0_120, %c1_121] : memref<4x6xf32, #tpu.memory_space<smem>>
    %230 = vector.broadcast %229 : f32 to vector<1x128xf32>
    %231 = arith.mulf %85, %230 : vector<1x128xf32>
    %232 = arith.addf %228, %231 : vector<1x128xf32>
    %c0_122 = arith.constant 0 : index
    %c2_123 = arith.constant 2 : index
    %233 = memref.load %arg4[%c0_122, %c2_123] : memref<4x6xf32, #tpu.memory_space<smem>>
    %234 = vector.broadcast %233 : f32 to vector<1x128xf32>
    %235 = arith.mulf %120, %234 : vector<1x128xf32>
    %236 = arith.addf %232, %235 : vector<1x128xf32>
    %c0_124 = arith.constant 0 : index
    %c3_125 = arith.constant 3 : index
    %237 = memref.load %arg4[%c0_124, %c3_125] : memref<4x6xf32, #tpu.memory_space<smem>>
    %238 = vector.broadcast %237 : f32 to vector<1x128xf32>
    %239 = arith.mulf %155, %238 : vector<1x128xf32>
    %240 = arith.addf %236, %239 : vector<1x128xf32>
    %c0_126 = arith.constant 0 : index
    %c4_127 = arith.constant 4 : index
    %241 = memref.load %arg4[%c0_126, %c4_127] : memref<4x6xf32, #tpu.memory_space<smem>>
    %242 = vector.broadcast %241 : f32 to vector<1x128xf32>
    %243 = arith.mulf %190, %242 : vector<1x128xf32>
    %244 = arith.addf %240, %243 : vector<1x128xf32>
    %c0_128 = arith.constant 0 : index
    %c5_129 = arith.constant 5 : index
    %245 = memref.load %arg4[%c0_128, %c5_129] : memref<4x6xf32, #tpu.memory_space<smem>>
    %246 = vector.broadcast %245 : f32 to vector<1x128xf32>
    %247 = arith.mulf %225, %246 : vector<1x128xf32>
    %248 = arith.addf %244, %247 : vector<1x128xf32>
    %c0_130 = arith.constant 0 : index
    %249 = memref.load %arg5[%c0_130] : memref<4xf32, #tpu.memory_space<smem>>
    %250 = vector.broadcast %249 : f32 to vector<1x128xf32>
    %251 = arith.addf %248, %250 : vector<1x128xf32>
    %252 = math.tanh %251 : vector<1x128xf32>
    %c1_131 = arith.constant 1 : index
    %c0_132 = arith.constant 0 : index
    %253 = memref.load %arg4[%c1_131, %c0_132] : memref<4x6xf32, #tpu.memory_space<smem>>
    %254 = vector.broadcast %253 : f32 to vector<1x128xf32>
    %255 = arith.mulf %50, %254 : vector<1x128xf32>
    %c1_133 = arith.constant 1 : index
    %c1_134 = arith.constant 1 : index
    %256 = memref.load %arg4[%c1_133, %c1_134] : memref<4x6xf32, #tpu.memory_space<smem>>
    %257 = vector.broadcast %256 : f32 to vector<1x128xf32>
    %258 = arith.mulf %85, %257 : vector<1x128xf32>
    %259 = arith.addf %255, %258 : vector<1x128xf32>
    %c1_135 = arith.constant 1 : index
    %c2_136 = arith.constant 2 : index
    %260 = memref.load %arg4[%c1_135, %c2_136] : memref<4x6xf32, #tpu.memory_space<smem>>
    %261 = vector.broadcast %260 : f32 to vector<1x128xf32>
    %262 = arith.mulf %120, %261 : vector<1x128xf32>
    %263 = arith.addf %259, %262 : vector<1x128xf32>
    %c1_137 = arith.constant 1 : index
    %c3_138 = arith.constant 3 : index
    %264 = memref.load %arg4[%c1_137, %c3_138] : memref<4x6xf32, #tpu.memory_space<smem>>
    %265 = vector.broadcast %264 : f32 to vector<1x128xf32>
    %266 = arith.mulf %155, %265 : vector<1x128xf32>
    %267 = arith.addf %263, %266 : vector<1x128xf32>
    %c1_139 = arith.constant 1 : index
    %c4_140 = arith.constant 4 : index
    %268 = memref.load %arg4[%c1_139, %c4_140] : memref<4x6xf32, #tpu.memory_space<smem>>
    %269 = vector.broadcast %268 : f32 to vector<1x128xf32>
    %270 = arith.mulf %190, %269 : vector<1x128xf32>
    %271 = arith.addf %267, %270 : vector<1x128xf32>
    %c1_141 = arith.constant 1 : index
    %c5_142 = arith.constant 5 : index
    %272 = memref.load %arg4[%c1_141, %c5_142] : memref<4x6xf32, #tpu.memory_space<smem>>
    %273 = vector.broadcast %272 : f32 to vector<1x128xf32>
    %274 = arith.mulf %225, %273 : vector<1x128xf32>
    %275 = arith.addf %271, %274 : vector<1x128xf32>
    %c1_143 = arith.constant 1 : index
    %276 = memref.load %arg5[%c1_143] : memref<4xf32, #tpu.memory_space<smem>>
    %277 = vector.broadcast %276 : f32 to vector<1x128xf32>
    %278 = arith.addf %275, %277 : vector<1x128xf32>
    %279 = math.tanh %278 : vector<1x128xf32>
    %c2_144 = arith.constant 2 : index
    %c0_145 = arith.constant 0 : index
    %280 = memref.load %arg4[%c2_144, %c0_145] : memref<4x6xf32, #tpu.memory_space<smem>>
    %281 = vector.broadcast %280 : f32 to vector<1x128xf32>
    %282 = arith.mulf %50, %281 : vector<1x128xf32>
    %c2_146 = arith.constant 2 : index
    %c1_147 = arith.constant 1 : index
    %283 = memref.load %arg4[%c2_146, %c1_147] : memref<4x6xf32, #tpu.memory_space<smem>>
    %284 = vector.broadcast %283 : f32 to vector<1x128xf32>
    %285 = arith.mulf %85, %284 : vector<1x128xf32>
    %286 = arith.addf %282, %285 : vector<1x128xf32>
    %c2_148 = arith.constant 2 : index
    %c2_149 = arith.constant 2 : index
    %287 = memref.load %arg4[%c2_148, %c2_149] : memref<4x6xf32, #tpu.memory_space<smem>>
    %288 = vector.broadcast %287 : f32 to vector<1x128xf32>
    %289 = arith.mulf %120, %288 : vector<1x128xf32>
    %290 = arith.addf %286, %289 : vector<1x128xf32>
    %c2_150 = arith.constant 2 : index
    %c3_151 = arith.constant 3 : index
    %291 = memref.load %arg4[%c2_150, %c3_151] : memref<4x6xf32, #tpu.memory_space<smem>>
    %292 = vector.broadcast %291 : f32 to vector<1x128xf32>
    %293 = arith.mulf %155, %292 : vector<1x128xf32>
    %294 = arith.addf %290, %293 : vector<1x128xf32>
    %c2_152 = arith.constant 2 : index
    %c4_153 = arith.constant 4 : index
    %295 = memref.load %arg4[%c2_152, %c4_153] : memref<4x6xf32, #tpu.memory_space<smem>>
    %296 = vector.broadcast %295 : f32 to vector<1x128xf32>
    %297 = arith.mulf %190, %296 : vector<1x128xf32>
    %298 = arith.addf %294, %297 : vector<1x128xf32>
    %c2_154 = arith.constant 2 : index
    %c5_155 = arith.constant 5 : index
    %299 = memref.load %arg4[%c2_154, %c5_155] : memref<4x6xf32, #tpu.memory_space<smem>>
    %300 = vector.broadcast %299 : f32 to vector<1x128xf32>
    %301 = arith.mulf %225, %300 : vector<1x128xf32>
    %302 = arith.addf %298, %301 : vector<1x128xf32>
    %c2_156 = arith.constant 2 : index
    %303 = memref.load %arg5[%c2_156] : memref<4xf32, #tpu.memory_space<smem>>
    %304 = vector.broadcast %303 : f32 to vector<1x128xf32>
    %305 = arith.addf %302, %304 : vector<1x128xf32>
    %306 = math.tanh %305 : vector<1x128xf32>
    %c3_157 = arith.constant 3 : index
    %c0_158 = arith.constant 0 : index
    %307 = memref.load %arg4[%c3_157, %c0_158] : memref<4x6xf32, #tpu.memory_space<smem>>
    %308 = vector.broadcast %307 : f32 to vector<1x128xf32>
    %309 = arith.mulf %50, %308 : vector<1x128xf32>
    %c3_159 = arith.constant 3 : index
    %c1_160 = arith.constant 1 : index
    %310 = memref.load %arg4[%c3_159, %c1_160] : memref<4x6xf32, #tpu.memory_space<smem>>
    %311 = vector.broadcast %310 : f32 to vector<1x128xf32>
    %312 = arith.mulf %85, %311 : vector<1x128xf32>
    %313 = arith.addf %309, %312 : vector<1x128xf32>
    %c3_161 = arith.constant 3 : index
    %c2_162 = arith.constant 2 : index
    %314 = memref.load %arg4[%c3_161, %c2_162] : memref<4x6xf32, #tpu.memory_space<smem>>
    %315 = vector.broadcast %314 : f32 to vector<1x128xf32>
    %316 = arith.mulf %120, %315 : vector<1x128xf32>
    %317 = arith.addf %313, %316 : vector<1x128xf32>
    %c3_163 = arith.constant 3 : index
    %c3_164 = arith.constant 3 : index
    %318 = memref.load %arg4[%c3_163, %c3_164] : memref<4x6xf32, #tpu.memory_space<smem>>
    %319 = vector.broadcast %318 : f32 to vector<1x128xf32>
    %320 = arith.mulf %155, %319 : vector<1x128xf32>
    %321 = arith.addf %317, %320 : vector<1x128xf32>
    %c3_165 = arith.constant 3 : index
    %c4_166 = arith.constant 4 : index
    %322 = memref.load %arg4[%c3_165, %c4_166] : memref<4x6xf32, #tpu.memory_space<smem>>
    %323 = vector.broadcast %322 : f32 to vector<1x128xf32>
    %324 = arith.mulf %190, %323 : vector<1x128xf32>
    %325 = arith.addf %321, %324 : vector<1x128xf32>
    %c3_167 = arith.constant 3 : index
    %c5_168 = arith.constant 5 : index
    %326 = memref.load %arg4[%c3_167, %c5_168] : memref<4x6xf32, #tpu.memory_space<smem>>
    %327 = vector.broadcast %326 : f32 to vector<1x128xf32>
    %328 = arith.mulf %225, %327 : vector<1x128xf32>
    %329 = arith.addf %325, %328 : vector<1x128xf32>
    %c3_169 = arith.constant 3 : index
    %330 = memref.load %arg5[%c3_169] : memref<4xf32, #tpu.memory_space<smem>>
    %331 = vector.broadcast %330 : f32 to vector<1x128xf32>
    %332 = arith.addf %329, %331 : vector<1x128xf32>
    %333 = math.tanh %332 : vector<1x128xf32>
    %c0_170 = arith.constant 0 : index
    %c0_171 = arith.constant 0 : index
    %334 = memref.load %arg6[%c0_170, %c0_171] : memref<2x4xf32, #tpu.memory_space<smem>>
    %335 = vector.broadcast %334 : f32 to vector<1x128xf32>
    %336 = arith.mulf %252, %335 : vector<1x128xf32>
    %c0_172 = arith.constant 0 : index
    %c1_173 = arith.constant 1 : index
    %337 = memref.load %arg6[%c0_172, %c1_173] : memref<2x4xf32, #tpu.memory_space<smem>>
    %338 = vector.broadcast %337 : f32 to vector<1x128xf32>
    %339 = arith.mulf %279, %338 : vector<1x128xf32>
    %340 = arith.addf %336, %339 : vector<1x128xf32>
    %c0_174 = arith.constant 0 : index
    %c2_175 = arith.constant 2 : index
    %341 = memref.load %arg6[%c0_174, %c2_175] : memref<2x4xf32, #tpu.memory_space<smem>>
    %342 = vector.broadcast %341 : f32 to vector<1x128xf32>
    %343 = arith.mulf %306, %342 : vector<1x128xf32>
    %344 = arith.addf %340, %343 : vector<1x128xf32>
    %c0_176 = arith.constant 0 : index
    %c3_177 = arith.constant 3 : index
    %345 = memref.load %arg6[%c0_176, %c3_177] : memref<2x4xf32, #tpu.memory_space<smem>>
    %346 = vector.broadcast %345 : f32 to vector<1x128xf32>
    %347 = arith.mulf %333, %346 : vector<1x128xf32>
    %348 = arith.addf %344, %347 : vector<1x128xf32>
    %c0_178 = arith.constant 0 : index
    %349 = memref.load %arg7[%c0_178] : memref<2xf32, #tpu.memory_space<smem>>
    %350 = vector.broadcast %349 : f32 to vector<1x128xf32>
    %351 = arith.addf %348, %350 : vector<1x128xf32>
    %352 = math.tanh %351 : vector<1x128xf32>
    %c1_179 = arith.constant 1 : index
    %c0_180 = arith.constant 0 : index
    %353 = memref.load %arg6[%c1_179, %c0_180] : memref<2x4xf32, #tpu.memory_space<smem>>
    %354 = vector.broadcast %353 : f32 to vector<1x128xf32>
    %355 = arith.mulf %252, %354 : vector<1x128xf32>
    %c1_181 = arith.constant 1 : index
    %c1_182 = arith.constant 1 : index
    %356 = memref.load %arg6[%c1_181, %c1_182] : memref<2x4xf32, #tpu.memory_space<smem>>
    %357 = vector.broadcast %356 : f32 to vector<1x128xf32>
    %358 = arith.mulf %279, %357 : vector<1x128xf32>
    %359 = arith.addf %355, %358 : vector<1x128xf32>
    %c1_183 = arith.constant 1 : index
    %c2_184 = arith.constant 2 : index
    %360 = memref.load %arg6[%c1_183, %c2_184] : memref<2x4xf32, #tpu.memory_space<smem>>
    %361 = vector.broadcast %360 : f32 to vector<1x128xf32>
    %362 = arith.mulf %306, %361 : vector<1x128xf32>
    %363 = arith.addf %359, %362 : vector<1x128xf32>
    %c1_185 = arith.constant 1 : index
    %c3_186 = arith.constant 3 : index
    %364 = memref.load %arg6[%c1_185, %c3_186] : memref<2x4xf32, #tpu.memory_space<smem>>
    %365 = vector.broadcast %364 : f32 to vector<1x128xf32>
    %366 = arith.mulf %333, %365 : vector<1x128xf32>
    %367 = arith.addf %363, %366 : vector<1x128xf32>
    %c1_187 = arith.constant 1 : index
    %368 = memref.load %arg7[%c1_187] : memref<2xf32, #tpu.memory_space<smem>>
    %369 = vector.broadcast %368 : f32 to vector<1x128xf32>
    %370 = arith.addf %367, %369 : vector<1x128xf32>
    %371 = math.tanh %370 : vector<1x128xf32>
    %c0_188 = arith.constant 0 : index
    %c0_189 = arith.constant 0 : index
    %372 = memref.load %arg8[%c0_188, %c0_189] : memref<1x2xf32, #tpu.memory_space<smem>>
    %373 = vector.broadcast %372 : f32 to vector<1x128xf32>
    %374 = arith.mulf %352, %373 : vector<1x128xf32>
    %c0_190 = arith.constant 0 : index
    %c1_191 = arith.constant 1 : index
    %375 = memref.load %arg8[%c0_190, %c1_191] : memref<1x2xf32, #tpu.memory_space<smem>>
    %376 = vector.broadcast %375 : f32 to vector<1x128xf32>
    %377 = arith.mulf %371, %376 : vector<1x128xf32>
    %378 = arith.addf %374, %377 : vector<1x128xf32>
    %c0_192 = arith.constant 0 : index
    %379 = memref.load %arg9[%c0_192] : memref<1xf32, #tpu.memory_space<smem>>
    %380 = vector.broadcast %379 : f32 to vector<1x128xf32>
    %381 = arith.addf %378, %380 : vector<1x128xf32>
    %382 = math.tanh %381 : vector<1x128xf32>
    %cst = arith.constant 5.000000e-01 : f32
    %383 = vector.broadcast %cst : f32 to vector<1x128xf32>
    %384 = arith.mulf %382, %383 : vector<1x128xf32>
    %cst_193 = arith.constant 5.000000e-01 : f32
    %385 = vector.broadcast %cst_193 : f32 to vector<1x128xf32>
    %386 = arith.addf %384, %385 : vector<1x128xf32>
    %c0_194 = arith.constant 0 : index
    %c0_195 = arith.constant 0 : index
    %387 = vector.load %arg10[%c0_194, %c0_195] : memref<1x128xf32, #tpu.memory_space<vmem>>, vector<1x128xf32>
    tpu.vector_store %arg10[%c0_194, %c0_195], %386 {strides = array<i32>} : memref<1x128xf32, #tpu.memory_space<vmem>>, vector<1x128xf32>,
    return
  }
  func.func @transform_0(%arg0: i32) -> (i32, i32, i32) {
    %c0_i32 = arith.constant 0 : i32
    %c0_i32_0 = arith.constant 0 : i32
    %c0_i32_1 = arith.constant 0 : i32
    return %c0_i32, %arg0, %c0_i32_0 : i32, i32, i32
  }
  func.func @transform_1(%arg0: i32) -> (i32, i32) {
    %c0_i32 = arith.constant 0 : i32
    %c0_i32_0 = arith.constant 0 : i32
    %c0_i32_1 = arith.constant 0 : i32
    return %c0_i32, %c0_i32_0 : i32, i32
  }
  func.func @transform_2(%arg0: i32) -> i32 {
    %c0_i32 = arith.constant 0 : i32
    %c0_i32_0 = arith.constant 0 : i32
    return %c0_i32 : i32
  }
  func.func @transform_3(%arg0: i32) -> (i32, i32) {
    %c0_i32 = arith.constant 0 : i32
    %c0_i32_0 = arith.constant 0 : i32
    %c0_i32_1 = arith.constant 0 : i32
    return %c0_i32, %c0_i32_0 : i32, i32
  }
  func.func @transform_4(%arg0: i32) -> i32 {
    %c0_i32 = arith.constant 0 : i32
    %c0_i32_0 = arith.constant 0 : i32
    return %c0_i32 : i32
  }
  func.func @transform_5(%arg0: i32) -> (i32, i32) {
    %c0_i32 = arith.constant 0 : i32
    %c0_i32_0 = arith.constant 0 : i32
    %c0_i32_1 = arith.constant 0 : i32
    return %c0_i32, %c0_i32_0 : i32, i32
  }
  func.func @transform_6(%arg0: i32) -> i32 {
    %c0_i32 = arith.constant 0 : i32
    %c0_i32_0 = arith.constant 0 : i32
    return %c0_i32 : i32
  }
  func.func @transform_7(%arg0: i32) -> (i32, i32) {
    %c0_i32 = arith.constant 0 : i32
    %c0_i32_0 = arith.constant 0 : i32
    %c0_i32_1 = arith.constant 0 : i32
    return %c0_i32, %c0_i32_0 : i32, i32
  }
  func.func @transform_8(%arg0: i32) -> i32 {
    %c0_i32 = arith.constant 0 : i32
    %c0_i32_0 = arith.constant 0 : i32
    return %c0_i32 : i32
  }
  func.func @transform_9(%arg0: i32) -> (i32, i32) {
    %c0_i32 = arith.constant 0 : i32
    %c0_i32_0 = arith.constant 0 : i32
    return %arg0, %c0_i32 : i32, i32
  }
}

</mosaic_0001>

<bundles_post_ra>
// kernel: _forward_impl.1
= control target key start
LH: loop header
LB: loop body
LE: loop exit
PB: predicated region body
PF: predicated region fallthrough
CT: control target
= control target key end

     0   :  { %15 = vsyncpa [#allocation4], 0  ;;  %s1073_s0 = inlined_call_operand.vmem [shape: f32[8,1,128], index: 0, kind: input, shape index: {}]   ;;  %s1074_s1 = inlined_call_operand.vmem [shape: f32[6,8], index: 1, kind: input, shape index: {}]   ;;  %s1075_s2 = inlined_call_operand.vmem [shape: f32[6], index: 2, kind: input, shape index: {}]   ;;  %s1076_s3 = inlined_call_operand.vmem [shape: f32[4,6], index: 3, kind: input, shape index: {}]   ;;  %s1077_s4 = inlined_call_operand.vmem [shape: f32[4], index: 4, kind: input, shape index: {}]   ;;  %s1078_s5 = inlined_call_operand.vmem [shape: f32[2,4], index: 5, kind: input, shape index: {}]   ;;  %s1079_s6 = inlined_call_operand.vmem [shape: f32[2], index: 6, kind: input, shape index: {}]   ;;  %s1080_s7 = inlined_call_operand.vmem [shape: f32[1,2], index: 7, kind: input, shape index: {}]   ;;  %s1081_s8 = inlined_call_operand.<no memory space> [shape: f32[1], index: 8, kind: input, shape index: {}]   ;;  %s1082_s9 = inlined_call_operand.vmem [shape: f32[1,128], index: 9, kind: output, shape index: {}]  }
   0x1   :  { %16 = vsyncpa [#allocation6], 0 }
   0x2   :  { %17 = vsyncpa [#allocation9], 0  ;;  %s35_s11 = sshll.u32 %s1075_s2, 4  ;;  %s36_s11 = int_to_ptr.vmem [resolvable:$true] %s35_s11 }
   0x3   :  { %18 = vsyncpa [#allocation12], 0  ;;  %s53_s14 = sshll.u32 %s1077_s4, 4  ;;  %s727_s15 = smov [#allocation5]   ;;  %s54_s14 = int_to_ptr.vmem [resolvable:$true] %s53_s14 }
   0x4   :  { %38 = dma.vmem_to_smem %s36_s11, 16, %s727_s15, [#allocation6]  }
   0x5   :  { %s728_s16 = smov [#allocation8]   ;;  %s71_s19 = sshll.u32 %s1079_s6, 4  ;;  %s72_s19 = int_to_ptr.vmem [resolvable:$true] %s71_s19 }
   0x6   :  { %56 = dma.vmem_to_smem %s54_s14, 16, %s728_s16, [#allocation9]  }
   0x7   :  { %s26_s2 = sshll.u32 %s1074_s1, 4  ;;  %s729_s22 = smov [#allocation11]   ;;  %s27_s2 = int_to_ptr.vmem [resolvable:$true] %s26_s2 }
   0x8   :  { %74 = dma.vmem_to_smem %s72_s19, 16, %s729_s22, [#allocation12]  }
   0x9   :  { %s730_s23 = smov [#allocation3]   ;;  %s44_s25 = sshll.u32 %s1076_s3, 4  ;;  %s45_s25 = int_to_ptr.vmem [resolvable:$true] %s44_s25 }
   0xa   :  { %29 = dma.vmem_to_smem %s27_s2, 128, %s730_s23, [#allocation4]  }
   0xb   :  { %s62_s28 = sshll.u32 %s1078_s5, 4  ;;  %s731_s6 = smov [#allocation7]   ;;  %s63_s28 = int_to_ptr.vmem [resolvable:$true] %s62_s28 }
   0xc   :  { %47 = dma.vmem_to_smem %s45_s25, 64, %s731_s6, [#allocation6]  }
   0xd   :  { %s732_s29 = smov [#allocation10]   ;;  %s80_s10 = sshll.u32 %s1080_s7, 4  ;;  %s81_s10 = int_to_ptr.vmem [resolvable:$true] %s80_s10 }
   0xe   :  { %65 = dma.vmem_to_smem %s63_s28, 32, %s732_s29, [#allocation9]  }
   0xf   :  { %s733_s11 = smov [#allocation13]  }
  0x10   :  { %83 = dma.vmem_to_smem %s81_s10, 16, %s733_s11, [#allocation12]  }
  0x11   :  { %719 = dma.done.wait [#allocation4], 128  }
  0x12   :  { %720 = vsyncadd [#allocation4], 4294967168 }
  0x13   :  { %721 = dma.done.wait [#allocation6], 80  }
  0x14   :  { %722 = vsyncadd [#allocation6], 4294967216 }
  0x15   :  { %723 = dma.done.wait [#allocation9], 48  }
  0x16   :  { %724 = vsyncadd [#allocation9], 4294967248 }
  0x17   :  { %725 = dma.done.wait [#allocation12], 32  }
  0x18   :  { %726 = vsyncadd [#allocation12], 4294967264 }
  0x19   :  { %114 = sfence }
  0x1a   :  { %s130_s3 = sld [smem:[#allocation3]]  ;;  %v810_v0 = vld [vmem:[%s1073_s0] sm:$0x1]  ;;  %v815_v1 = vld [vmem:[%s1073_s0 + $0x1] sm:$0x1] }
  0x1b   :  { %s515_s5 = sld [smem:[#allocation3 + $0x1]]  ;;  %v830_v6 = vld [vmem:[%s1073_s0 + $0x2] sm:$0x1]  ;;  %v836_v10 = vld [vmem:[%s1073_s0 + $0x3] sm:$0x1] }
  0x1c   :  { %s516_s12 = sld [smem:[#allocation3 + $0x2]]  ;;  %v851_v17 = vld [vmem:[%s1073_s0 + $0x4] sm:$0x1]  ;;  %v862_v26 = vld [vmem:[%s1073_s0 + $0x5] sm:$0x1] }
  0x1d   :  { %s517_s13 = sld [smem:[#allocation3 + $0x3]]  ;;  %v874_v31 = vld [vmem:[%s1073_s0 + $0x6] sm:$0x1]  ;;  %v895_v50 = vld [vmem:[%s1073_s0 + $0x7] sm:$0x1] }
  0x1e   :  { %s805_s14 = sld [smem:[#allocation3 + $0x4]] }
  0x1f   :  { %s817_s18 = sld [smem:[#allocation3 + $0x5]] }
  0x20   :  { %v131_v2 = vstv %s130_s3  ;;  %s819_s19 = sld [smem:[#allocation3 + $0x6]] }
  0x21   :  { %v134_v3 = vstv %s515_s5  ;;  %s821_s20 = sld [smem:[#allocation3 + $0x7]]  ;;  %v132_v4 = vmul.f32 %v131_v2, %v810_v0 }
  0x22   :  { %v135_v5 = vmul.f32 %v815_v1, %v134_v3  ;;  %s825_s21 = sld [smem:[#allocation5]]  ;;  %v138_v7 = vstv %s516_s12 }
  0x23   :  { %s522_s23 = sld [smem:[#allocation3 + $0x80]]  ;;  %v139_v9 = vmul.f32 %v830_v6, %v138_v7  ;;  %v142_v11 = vstv %s517_s13 }
  0x24   :  { %s523_s4 = sld [smem:[#allocation3 + $0x81]]  ;;  %v136_v8 = vadd.f32 %v135_v5, %v132_v4  ;;  %v143_v14 = vmul.f32 %v836_v10, %v142_v11  ;;  %v146_v18 = vstv %s805_s14 }
  0x25   :  { %s524_s24 = sld [smem:[#allocation3 + $0x82]]  ;;  %v147_v25 = vmul.f32 %v851_v17, %v146_v18  ;;  %v150_v27 = vstv %s817_s18 }
  0x26   :  { %s525_s25 = sld [smem:[#allocation3 + $0x83]]  ;;  %v140_v13 = vadd.f32 %v139_v9, %v136_v8  ;;  %v151_v33 = vmul.f32 %v862_v26, %v150_v27  ;;  %v154_v34 = vstv %s819_s19 }
  0x27   :  { %s838_s28 = sld [smem:[#allocation3 + $0x84]]  ;;  %v155_v43 = vmul.f32 %v874_v31, %v154_v34  ;;  %v158_v51 = vstv %s821_s20 }
  0x28   :  { %s840_s6 = sld [smem:[#allocation3 + $0x85]]  ;;  %v144_v24 = vadd.f32 %v143_v14, %v140_v13  ;;  %v159_v59 = vmul.f32 %v895_v50, %v158_v51 }
  0x29   :  { %v166_v12 = vstv %s522_s23  ;;  %s842_s29 = sld [smem:[#allocation3 + $0x86]] }
  0x2a   :  { %v167_v15 = vmul.f32 %v166_v12, %v810_v0  ;;  %v169_v16 = vstv %s523_s4  ;;  %s846_s1 = sld [smem:[#allocation3 + $0x87]]  ;;  %v148_v32 = vadd.f32 %v147_v25, %v144_v24  ;;  %v162_v25 = vstv %s825_s21 }
  0x2b   :  { %v170_v19 = vmul.f32 %v815_v1, %v169_v16  ;;  %v173_v20 = vstv %s524_s24  ;;  %s855_s11 = sld [smem:[#allocation5 + $0x1]] }
  0x2c   :  { %v174_v21 = vmul.f32 %v830_v6, %v173_v20  ;;  %s531_s3 = sld [smem:[#allocation3 + $0x100]]  ;;  %v177_v23 = vstv %s525_s25  ;;  %v152_v46 = vadd.f32 %v151_v33, %v148_v32 }
  0x2d   :  { %v171_v22 = vadd.f32 %v170_v19, %v167_v15  ;;  %s532_s5 = sld [smem:[#allocation3 + $0x101]]  ;;  %v178_v29 = vmul.f32 %v836_v10, %v177_v23  ;;  %v181_v30 = vstv %s838_s28 }
  0x2e   :  { %s533_s12 = sld [smem:[#allocation3 + $0x102]]  ;;  %v182_v36 = vmul.f32 %v851_v17, %v181_v30  ;;  %v185_v40 = vstv %s840_s6  ;;  %v156_v58 = vadd.f32 %v155_v43, %v152_v46 }
  0x2f   :  { %s534_s14 = sld [smem:[#allocation3 + $0x103]]  ;;  %v175_v28 = vadd.f32 %v174_v21, %v171_v22  ;;  %v186_v52 = vmul.f32 %v862_v26, %v185_v40  ;;  %v189_v53 = vstv %s842_s29 }
  0x30   :  { %s867_s7 = sld [smem:[#allocation3 + $0x104]]  ;;  %v190_v61 = vmul.f32 %v874_v31, %v189_v53  ;;  %v193_v8 = vstv %s846_s1  ;;  %v160_v12 = vadd.f32 %v159_v59, %v156_v58 }
  0x31   :  { %s869_s16 = sld [smem:[#allocation3 + $0x105]]  ;;  %v179_v39 = vadd.f32 %v178_v29, %v175_v28  ;;  %v194_v22 = vmul.f32 %v895_v50, %v193_v8 }
  0x32   :  { %v201_v35 = vstv %s531_s3  ;;  %s878_s18 = sld [smem:[#allocation3 + $0x106]] }
  0x33   :  { %v202_v37 = vmul.f32 %v201_v35, %v810_v0  ;;  %v204_v38 = vstv %s532_s5  ;;  %s882_s22 = sld [smem:[#allocation3 + $0x107]]  ;;  %v183_v54 = vadd.f32 %v182_v36, %v179_v39  ;;  %v163_v35 = vadd.f32 %v162_v25, %v160_v12 }
  0x34   :  { %v205_v41 = vmul.f32 %v815_v1, %v204_v38  ;;  %v208_v42 = vstv %s533_s12  ;;  %s886_s23 = sld [smem:[#allocation5 + $0x2]] }
  0x35   :  { %v209_v44 = vmul.f32 %v830_v6, %v208_v42  ;;  %v212_v45 = vstv %s534_s14  ;;  %s540_s19 = sld [smem:[#allocation3 + $0x180]]  ;;  %v187_v3 = vadd.f32 %v186_v52, %v183_v54  ;;  %609 = vtanh.f32 %v163_v35 }
  0x36   :  { %v206_v47 = vadd.f32 %v205_v41, %v202_v37  ;;  %v213_v48 = vmul.f32 %v836_v10, %v212_v45  ;;  %v216_v49 = vstv %s867_s7  ;;  %s541_s4 = sld [smem:[#allocation3 + $0x181]]  ;;  %v197_v37 = vstv %s855_s11 }
  0x37   :  { %s542_s26 = sld [smem:[#allocation3 + $0x182]]  ;;  %v217_v56 = vmul.f32 %v851_v17, %v216_v49  ;;  %v220_v57 = vstv %s869_s16  ;;  %v191_v21 = vadd.f32 %v190_v61, %v187_v3 }
  0x38   :  { %v210_v55 = vadd.f32 %v209_v44, %v206_v47  ;;  %s543_s27 = sld [smem:[#allocation3 + $0x183]]  ;;  %v221_v62 = vmul.f32 %v862_v26, %v220_v57  ;;  %v224_v63 = vstv %s878_s18 }
  0x39   :  { %s902_s28 = sld [smem:[#allocation3 + $0x184]]  ;;  %v225_v13 = vmul.f32 %v874_v31, %v224_v63  ;;  %v228_v23 = vstv %s882_s22  ;;  %v195_v36 = vadd.f32 %v194_v22, %v191_v21 }
  0x3a   :  { %v214_v60 = vadd.f32 %v213_v48, %v210_v55  ;;  %s905_s0 = sld [smem:[#allocation3 + $0x185]]  ;;  %v229_v32 = vmul.f32 %v895_v50, %v228_v23  ;;  %v232_v43 = vstv %s886_s23 }
  0x3b   :  { %v236_v2 = vstv %s540_s19  ;;  %s910_s20 = sld [smem:[#allocation3 + $0x186]]  ;;  %v198_v52 = vadd.f32 %v197_v37, %v195_v36 }
  0x3c   :  { %v218_v4 = vadd.f32 %v217_v56, %v214_v60  ;;  %v237_v5 = vmul.f32 %v236_v2, %v810_v0  ;;  %v239_v7 = vstv %s541_s4  ;;  %s913_s6 = sld [smem:[#allocation3 + $0x187]] }
  0x3d   :  { %v240_v9 = vmul.f32 %v815_v1, %v239_v7  ;;  %v243_v11 = vstv %s542_s26  ;;  %s917_s29 = sld [smem:[#allocation5 + $0x3]]  ;;  %611 = vtanh.f32 %v198_v52 }
  0x3e   :  { %v244_v14 = vmul.f32 %v830_v6, %v243_v11  ;;  %v247_v15 = vstv %s543_s27  ;;  %s549_s30 = sld [smem:[#allocation3 + $0x200]]  ;;  %v222_v16 = vadd.f32 %v221_v62, %v218_v4 }
  0x3f   :  { %v241_v18 = vadd.f32 %v240_v9, %v237_v5  ;;  %v248_v19 = vmul.f32 %v836_v10, %v247_v15  ;;  %v251_v20 = vstv %s902_s28  ;;  %s550_s1 = sld [smem:[#allocation3 + $0x201]] }
  0x40   :  { %v255_v24 = vstv %s905_s0  ;;  %s551_s10 = sld [smem:[#allocation3 + $0x202]]  ;;  %v252_v28 = vmul.f32 %v851_v17, %v251_v20  ;;  %v226_v30 = vadd.f32 %v225_v13, %v222_v16 }
  0x41   :  { %v245_v27 = vadd.f32 %v244_v14, %v241_v18  ;;  %s552_s3 = sld [smem:[#allocation3 + $0x203]]  ;;  %v259_v29 = vstv %s910_s20  ;;  %v256_v34 = vmul.f32 %v862_v26, %v255_v24 }
  0x42   :  { %s929_s5 = sld [smem:[#allocation3 + $0x204]]  ;;  %v260_v40 = vmul.f32 %v874_v31, %v259_v29  ;;  %v263_v44 = vstv %s913_s6  ;;  %v230_v47 = vadd.f32 %v229_v32, %v226_v30 }
  0x43   :  { %v249_v33 = vadd.f32 %v248_v19, %v245_v27  ;;  %s933_s12 = sld [smem:[#allocation3 + $0x205]]  ;;  %v264_v57 = vmul.f32 %v895_v50, %v263_v44  ;;  %v267_v4 = vstv %s917_s29 }
  0x44   :  { %v271_v38 = vstv %s549_s30  ;;  %s936_s21 = sld [smem:[#allocation3 + $0x206]]  ;;  %v233_v61 = vadd.f32 %v232_v43, %v230_v47 }
  0x45   :  { %v253_v39 = vadd.f32 %v252_v28, %v249_v33  ;;  %v272_v41 = vmul.f32 %v271_v38, %v810_v0  ;;  %v274_v42 = vstv %s550_s1  ;;  %s940_s13 = sld [smem:[#allocation3 + $0x207]] }
  0x46   :  { %v275_v45 = vmul.f32 %v815_v1, %v274_v42  ;;  %v278_v46 = vstv %s551_s10  ;;  %s945_s15 = sld [smem:[#allocation5 + $0x4]]  ;;  %613 = vtanh.f32 %v233_v61 }
  0x47   :  { %v257_v48 = vadd.f32 %v256_v34, %v253_v39  ;;  %v279_v49 = vmul.f32 %v830_v6, %v278_v46  ;;  %v282_v51 = vstv %s552_s3  ;;  %s558_s11 = sld [smem:[#allocation3 + $0x280]] }
  0x48   :  { %v276_v53 = vadd.f32 %v275_v45, %v272_v41  ;;  %v283_v54 = vmul.f32 %v836_v10, %v282_v51  ;;  %v286_v55 = vstv %s929_s5  ;;  %s559_s14 = sld [smem:[#allocation3 + $0x281]] }
  0x49   :  { %v261_v56 = vadd.f32 %v260_v40, %v257_v48  ;;  %v290_v58 = vstv %s933_s12  ;;  %s560_s7 = sld [smem:[#allocation3 + $0x282]]  ;;  %v287_v60 = vmul.f32 %v851_v17, %v286_v55 }
  0x4a   :  { %v280_v59 = vadd.f32 %v279_v49, %v276_v53  ;;  %s953_s16 = sld [smem:[#allocation3 + $0x283]]  ;;  %v294_v62 = vstv %s936_s21  ;;  %v291_v2 = vmul.f32 %v862_v26, %v290_v58 }
  0x4b   :  { %s956_s17 = sld [smem:[#allocation3 + $0x284]]  ;;  %v265_v3 = vadd.f32 %v264_v57, %v261_v56  ;;  %v298_v5 = vstv %s940_s13  ;;  %v295_v9 = vmul.f32 %v874_v31, %v294_v62 }
  0x4c   :  { %v284_v63 = vadd.f32 %v283_v54, %v280_v59  ;;  %s959_s2 = sld [smem:[#allocation3 + $0x285]]  ;;  %v299_v16 = vmul.f32 %v895_v50, %v298_v5  ;;  %v302_v27 = vstv %s945_s15 }
  0x4d   :  { %v306_v7 = vstv %s558_s11  ;;  %s963_s18 = sld [smem:[#allocation3 + $0x286]]  ;;  %v268_v20 = vadd.f32 %v267_v4, %v265_v3 }
  0x4e   :  { %v288_v8 = vadd.f32 %v287_v60, %v284_v63  ;;  %v307_v11 = vmul.f32 %v306_v7, %v810_v0  ;;  %v309_v12 = vstv %s559_s14  ;;  %s967_s22 = sld [smem:[#allocation3 + $0x287]]  ;;  %v975_v0 = vpop.eup %609 }
  0x4f   :  { %v310_v13 = vmul.f32 %v815_v1, %v309_v12  ;;  %v313_v14 = vstv %s560_s7  ;;  %s970_s23 = sld [smem:[#allocation5 + $0x5]]  ;;  %v979_v23 = vpop.eup %611  ;;  %615 = vtanh.f32 %v268_v20 }
  0x50   :  { %v292_v15 = vadd.f32 %v291_v2, %v288_v8  ;;  %v314_v18 = vmul.f32 %v830_v6, %v313_v14  ;;  %v317_v19 = vstv %s953_s16  ;;  %s340_s19 = sld [smem:[#allocation7]]  ;;  %v989_v32 = vpop.eup %613 }
  0x51   :  { %v311_v21 = vadd.f32 %v310_v13, %v307_v11  ;;  %v318_v22 = vmul.f32 %v836_v10, %v317_v19  ;;  %v321_v1 = vstv %s956_s17  ;;  %s567_s4 = sld [smem:[#allocation7 + $0x1]] }
  0x52   :  { %v296_v24 = vadd.f32 %v295_v9, %v292_v15  ;;  %v325_v25 = vstv %s959_s2  ;;  %s568_s24 = sld [smem:[#allocation7 + $0x2]]  ;;  %v322_v6 = vmul.f32 %v851_v17, %v321_v1 }
  0x53   :  { %v315_v28 = vadd.f32 %v314_v18, %v311_v21  ;;  %s984_s25 = sld [smem:[#allocation7 + $0x3]]  ;;  %v329_v30 = vstv %s963_s18  ;;  %v326_v33 = vmul.f32 %v862_v26, %v325_v25 }
  0x54   :  { %v300_v29 = vadd.f32 %v299_v16, %v296_v24  ;;  %s987_s26 = sld [smem:[#allocation7 + $0x4]]  ;;  %v333_v35 = vstv %s967_s22  ;;  %v330_v37 = vmul.f32 %v874_v31, %v329_v30 }
  0x55   :  { %v319_v10 = vadd.f32 %v318_v22, %v315_v28  ;;  %s992_s27 = sld [smem:[#allocation7 + $0x5]]  ;;  %v334_v42 = vmul.f32 %v895_v50, %v333_v35  ;;  %v1002_v31 = vpop.eup %615  ;;  %v337_v47 = vstv %s970_s23 }
  0x56   :  { %v303_v34 = vadd.f32 %v302_v27, %v300_v29  ;;  %v341_v36 = vstv %s340_s19  ;;  %s995_s28 = sld [smem:[#allocation8]] }
  0x57   :  { %v323_v17 = vadd.f32 %v322_v6, %v319_v10  ;;  %v342_v38 = vmul.f32 %v975_v0, %v341_v36  ;;  %v344_v39 = vstv %s567_s4  ;;  %s572_s0 = sld [smem:[#allocation7 + $0x80]] }
  0x58   :  { %v345_v40 = vmul.f32 %v979_v23, %v344_v39  ;;  %v348_v41 = vstv %s568_s24  ;;  %s573_s20 = sld [smem:[#allocation7 + $0x81]]  ;;  %617 = vtanh.f32 %v303_v34 }
  0x59   :  { %v327_v26 = vadd.f32 %v326_v33, %v323_v17  ;;  %s574_s6 = sld [smem:[#allocation7 + $0x82]]  ;;  %v349_v44 = vmul.f32 %v989_v32, %v348_v41  ;;  %v352_v46 = vstv %s984_s25 }
  0x5a   :  { %v346_v43 = vadd.f32 %v345_v40, %v342_v38  ;;  %s575_s29 = sld [smem:[#allocation7 + $0x83]]  ;;  %v353_v50 = vmul.f32 %v1002_v31, %v352_v46  ;;  %v356_v56 = vstv %s987_s26 }
  0x5b   :  { %v331_v45 = vadd.f32 %v330_v37, %v327_v26  ;;  %s576_s30 = sld [smem:[#allocation7 + $0x84]]  ;;  %v360_v7 = vstv %s992_s27 }
  0x5c   :  { %s1006_s1 = sld [smem:[#allocation7 + $0x85]]  ;;  %v350_v51 = vadd.f32 %v349_v44, %v346_v43  ;;  %v364_v27 = vstv %s995_s28 }
  0x5d   :  { %v335_v48 = vadd.f32 %v334_v42, %v331_v45  ;;  %v368_v49 = vstv %s572_s0  ;;  %s1008_s10 = sld [smem:[#allocation8 + $0x1]] }
  0x5e   :  { %v369_v52 = vmul.f32 %v975_v0, %v368_v49  ;;  %v371_v53 = vstv %s573_s20  ;;  %s579_s3 = sld [smem:[#allocation7 + $0x100]]  ;;  %v1012_v54 = vpop.eup %617  ;;  %v354_v63 = vadd.f32 %v353_v50, %v350_v51 }
  0x5f   :  { %v338_v55 = vadd.f32 %v337_v47, %v335_v48  ;;  %v372_v57 = vmul.f32 %v979_v23, %v371_v53  ;;  %v375_v58 = vstv %s574_s6  ;;  %s580_s5 = sld [smem:[#allocation7 + $0x101]]  ;;  %v357_v2 = vmul.f32 %v1012_v54, %v356_v56 }
  0x60   :  { %v376_v59 = vmul.f32 %v989_v32, %v375_v58  ;;  %v379_v60 = vstv %s575_s29  ;;  %s581_s12 = sld [smem:[#allocation7 + $0x102]] }
  0x61   :  { %619 = vtanh.f32 %v338_v55  ;;  %v373_v61 = vadd.f32 %v372_v57, %v369_v52  ;;  %v380_v62 = vmul.f32 %v1002_v31, %v379_v60  ;;  %s582_s21 = sld [smem:[#allocation7 + $0x103]]  ;;  %v383_v3 = vstv %s576_s30 }
  0x62   :  { %s1019_s13 = sld [smem:[#allocation7 + $0x104]]  ;;  %v384_v5 = vmul.f32 %v1012_v54, %v383_v3  ;;  %v387_v11 = vstv %s1006_s1  ;;  %v358_v14 = vadd.f32 %v357_v2, %v354_v63 }
  0x63   :  { %v377_v4 = vadd.f32 %v376_v59, %v373_v61  ;;  %s1022_s15 = sld [smem:[#allocation7 + $0x105]]  ;;  %v391_v28 = vstv %s1008_s10 }
  0x64   :  { %v395_v8 = vstv %s579_s3  ;;  %s1025_s11 = sld [smem:[#allocation8 + $0x2]] }
  0x65   :  { %v381_v9 = vadd.f32 %v380_v62, %v377_v4  ;;  %v396_v12 = vmul.f32 %v975_v0, %v395_v8  ;;  %v398_v13 = vstv %s580_s5  ;;  %s586_s14 = sld [smem:[#allocation7 + $0x180]] }
  0x66   :  { %v399_v15 = vmul.f32 %v979_v23, %v398_v13  ;;  %v402_v16 = vstv %s581_s12  ;;  %s1030_s7 = sld [smem:[#allocation7 + $0x181]] }
  0x67   :  { %v620_v18 = vpop.eup %619  ;;  %v385_v19 = vadd.f32 %v384_v5, %v381_v9  ;;  %v403_v20 = vmul.f32 %v989_v32, %v402_v16  ;;  %v406_v21 = vstv %s582_s21  ;;  %s588_s16 = sld [smem:[#allocation7 + $0x182]] }
  0x68   :  { %v361_v22 = vmul.f32 %v620_v18, %v360_v7  ;;  %v388_v1 = vmul.f32 %v620_v18, %v387_v11  ;;  %v400_v24 = vadd.f32 %v399_v15, %v396_v12  ;;  %v407_v25 = vmul.f32 %v1002_v31, %v406_v21  ;;  %s1034_s17 = sld [smem:[#allocation7 + $0x183]] }
  0x69   :  { %v410_v6 = vstv %s1019_s13  ;;  %v414_v29 = vstv %s1022_s15  ;;  %s1040_s2 = sld [smem:[#allocation7 + $0x184]] }
  0x6a   :  { %v362_v30 = vadd.f32 %v361_v22, %v358_v14  ;;  %v389_v10 = vadd.f32 %v388_v1, %v385_v19  ;;  %v404_v33 = vadd.f32 %v403_v20, %v400_v24  ;;  %v411_v34 = vmul.f32 %v1012_v54, %v410_v6  ;;  %s1043_s18 = sld [smem:[#allocation7 + $0x185]] }
  0x6b   :  { %v415_v35 = vmul.f32 %v620_v18, %v414_v29  ;;  %v422_v36 = vstv %s586_s14  ;;  %s1047_s22 = sld [smem:[#allocation10]]  ;;  %v418_v44 = vstv %s1025_s11 }
  0x6c   :  { %v365_v17 = vadd.f32 %v364_v27, %v362_v30  ;;  %v392_v37 = vadd.f32 %v391_v28, %v389_v10  ;;  %v408_v38 = vadd.f32 %v407_v25, %v404_v33  ;;  %v423_v39 = vmul.f32 %v975_v0, %v422_v36  ;;  %s1051_s23 = sld [smem:[#allocation10 + $0x1]] }
  0x6d   :  { %v425_v40 = vstv %s1030_s7  ;;  %v429_v41 = vstv %s588_s16  ;;  %s1056_s19 = sld [smem:[#allocation8 + $0x3]] }
  0x6e   :  { %v412_v26 = vadd.f32 %v411_v34, %v408_v38  ;;  %v426_v42 = vmul.f32 %v979_v23, %v425_v40  ;;  %v430_v43 = vmul.f32 %v989_v32, %v429_v41  ;;  %621 = vtanh.f32 %v365_v17  ;;  %s1059_s4 = sld [smem:[#allocation10 + $0x2]] }
  0x6f   :  { %v433_v45 = vstv %s1034_s17  ;;  %v437_v46 = vstv %s1040_s2  ;;  %623 = vtanh.f32 %v392_v37  ;;  %s596_s24 = sld [smem:[#allocation10 + $0x80]]  ;;  %v494_v34 = vstv %s1081_s8 }
  0x70   :  { %v416_v0 = vadd.f32 %v415_v35, %v412_v26  ;;  %v427_v47 = vadd.f32 %v426_v42, %v423_v39  ;;  %v434_v48 = vmul.f32 %v1002_v31, %v433_v45  ;;  %v441_v23 = vstv %s1043_s18  ;;  %s597_s25 = sld [smem:[#allocation10 + $0x81]] }
  0x71   :  { %v438_v51 = vmul.f32 %v1012_v54, %v437_v46  ;;  %s598_s26 = sld [smem:[#allocation10 + $0x82]]  ;;  %v442_v52 = vmul.f32 %v620_v18, %v441_v23  ;;  %v449_v31 = vstv %s1047_s22 }
  0x72   :  { %v419_v32 = vadd.f32 %v418_v44, %v416_v0  ;;  %v431_v49 = vadd.f32 %v430_v43, %v427_v47  ;;  %v452_v57 = vstv %s1051_s23  ;;  %s595_s27 = sld [smem:[#allocation10 + $0x3]] }
  0x73   :  { %v445_v58 = vstv %s1056_s19  ;;  %s599_s28 = sld [smem:[#allocation10 + $0x83]] }
  0x74   :  { %625 = vtanh.f32 %v419_v32  ;;  %v435_v50 = vadd.f32 %v434_v48, %v431_v49  ;;  %v622_v53 = vpop.eup %621  ;;  %v456_v5 = vstv %s1059_s4  ;;  %s463_s0 = sld [smem:[#allocation11]] }
  0x75   :  { %v624_v55 = vpop.eup %623  ;;  %v468_v59 = vstv %s596_s24  ;;  %v450_v62 = vmul.f32 %v622_v53, %v449_v31  ;;  %s600_s20 = sld [smem:[#allocation11 + $0x1]] }
  0x76   :  { %v439_v56 = vadd.f32 %v438_v51, %v435_v50  ;;  %v471_v61 = vstv %s597_s25  ;;  %v453_v63 = vmul.f32 %v624_v55, %v452_v57  ;;  %v469_v54 = vmul.f32 %v622_v53, %v468_v59  ;;  %s486_s6 = sld [smem:[#allocation13]] }
  0x77   :  { %v472_v2 = vmul.f32 %v624_v55, %v471_v61  ;;  %v475_v7 = vstv %s598_s26  ;;  %s601_s29 = sld [smem:[#allocation13 + $0x1]] }
  0x78   :  { %v443_v60 = vadd.f32 %v442_v52, %v439_v56  ;;  %v454_v8 = vadd.f32 %v453_v63, %v450_v62  ;;  %v460_v13 = vstv %s595_s27 }
  0x79   :  { %v473_v11 = vadd.f32 %v472_v2, %v469_v54  ;;  %v479_v14 = vstv %s599_s28 }
  0x7a   :  { %v626_v3 = vpop.eup %625  ;;  %v446_v4 = vadd.f32 %v445_v58, %v443_v60  ;;  %v464_v21 = vstv %s463_s0 }
  0x7b   :  { %v457_v9 = vmul.f32 %v626_v3, %v456_v5  ;;  %v476_v12 = vmul.f32 %v626_v3, %v475_v7  ;;  %v483_v22 = vstv %s600_s20 }
  0x7c   :  { %627 = vtanh.f32 %v446_v4  ;;  %v487_v28 = vstv %s486_s6 }
  0x7d   :  { %v458_v15 = vadd.f32 %v457_v9, %v454_v8  ;;  %v477_v16 = vadd.f32 %v476_v12, %v473_v11  ;;  %v490_v6 = vstv %s601_s29 }
  0x82   :  { %v628_v18 = vpop.eup %627 }
  0x83   :  { %v461_v19 = vmul.f32 %v628_v18, %v460_v13  ;;  %v480_v20 = vmul.f32 %v628_v18, %v479_v14 }
  0x85   :  { %v462_v1 = vadd.f32 %v461_v19, %v458_v15  ;;  %v481_v24 = vadd.f32 %v480_v20, %v477_v16 }
  0x87   :  { %v465_v25 = vadd.f32 %v464_v21, %v462_v1  ;;  %v484_v27 = vadd.f32 %v483_v22, %v481_v24 }
  0x89   :  { %629 = vtanh.f32 %v465_v25 }
  0x8a   :  { %631 = vtanh.f32 %v484_v27 }
  0x8f   :  { %v630_v29 = vpop.eup %629 }
  0x90   :  { %v632_v30 = vpop.eup %631  ;;  %v488_v10 = vmul.f32 %v630_v29, %v487_v28 }
  0x91   :  { %v491_v33 = vmul.f32 %v632_v30, %v490_v6 }
  0x93   :  { %v492_v35 = vadd.f32 %v491_v33, %v488_v10 }
  0x95   :  { %v495_v36 = vadd.f32 %v494_v34, %v492_v35 }
  0x97   :  { %633 = vtanh.f32 %v495_v36 }
  0x9d   :  { %v634_v17 = vpop.eup %633 }
  0x9e   :  { %v497_v37 = vmul.f32 0.5, %v634_v17 }
  0xa0   :  { %v498_v38 = vadd.f32 0.5, %v497_v37 }
  0xa2   :  { %499 = vst [vmem:[%s1082_s9] sm:$0x1] %v498_v38 }
  0xa3   :  { %504 = vsyncpa [#allocation4], 1 }
  0xa4   :  { %505 = vsyncpa [#allocation6], 1 }
  0xa5   :  { %506 = vsyncpa [#allocation9], 1 }
  0xa6   :  { %507 = vsyncpa [#allocation12], 1 }

</bundles_post_ra>
